<compile_context>
chip_gen: v7x
topology: tpu7x:2x2x1
jax: 0.10.0
libtpu: 0.0.40
codegen_flags: <defaults>
</compile_context>

<pallas_src>
import functools

import jax
import jax.numpy as jnp
from jax import lax
from jax.experimental import pallas as pl
from jax.experimental.pallas import tpu as pltpu


# ----------------------------- Pallas kernel -------------------------------


def _malstm_kernel(xp_ref, last_ref, wbd_ref, out_ref,
                   h_ref, c_ref, hl_ref, *, TB, H):
    """One fused recurrence for BOTH sentence chains.

    Column layout (gate-major, then chain; each block H lanes wide):
      gates / xp : [B, 8H] = [i0 i1 | f0 f1 | o0 o1 | g0 g1]
      h, c, hl   : [B, 2H] = [h0 | h1]
    The g-gate pre-activations are pre-scaled by 2 in the wrapper, so
    tanh(z) = 2*sigmoid(2z) - 1 and one sigmoid covers all four gates.

    xp_ref  : [TB, B, 8H] bf16  pre-projected inputs (x @ W_ih + b), this T-block
    last_ref: [B, 2H]     int32 (sent_length - 1), broadcast per chain half
    wbd_ref : [2H, 8H]    bf16  block-diagonal recurrent weights
    out_ref : [B, 1]      f32   exp(-||h0_last - h1_last + 1e-6||_1)
    h/c/hl  : [B, 2H]     f32   persistent VMEM carries across the T grid
    """
    H2 = 2 * H
    t0 = pl.program_id(0)

    @pl.when(t0 == 0)
    def _():
        h_ref[...] = jnp.zeros_like(h_ref)
        c_ref[...] = jnp.zeros_like(c_ref)
        hl_ref[...] = jnp.zeros_like(hl_ref)

    # loop invariants — hoisted once per grid step (JAX does not CSE these)
    wbd = wbd_ref[...]          # [2H, 8H] bf16
    lastm = last_ref[...]       # [B, 2H] int32
    t_base = t0 * TB

    def step(t, carry):
        h, c, hl = carry
        # one block-diagonal MXU dot drives both chains' recurrent term
        gates = jnp.dot(h.astype(jnp.bfloat16), wbd,
                        preferred_element_type=jnp.float32) + xp_ref[t]
        s = jax.nn.sigmoid(gates)                 # single EUP pass, all 4 gates
        i_g = s[:, 0:H2]
        f_g = s[:, H2:2 * H2]
        o_g = s[:, 2 * H2:3 * H2]
        g_g = 2.0 * s[:, 3 * H2:4 * H2] - 1.0     # tanh via scaled sigmoid
        c = f_g * c + i_g * g_g
        h = o_g * jnp.tanh(c)
        hl = jnp.where(lastm == t_base + t, h, hl)
        return h, c, hl

    carry = (h_ref[...], c_ref[...], hl_ref[...])
    h, c, hl = lax.fori_loop(0, TB, step, carry, unroll=True)
    h_ref[...] = h
    c_ref[...] = c
    hl_ref[...] = hl

    @pl.when(t0 == pl.num_programs(0) - 1)
    def _():
        # F.pairwise_distance(h0, h1, p=1): ||h0 - h1 + 1e-6||_1
        d = hl[:, 0:H] - hl[:, H:H2] + 1e-6
        out_ref[...] = jnp.exp(-jnp.sum(jnp.abs(d), axis=-1, keepdims=True))


# ------------------------------- wrapper ------------------------------------


def malstm_forward(sentences, sent_lengths, orders, params, *, hidden_dim,
                   t_block=4):
    """sentences: [2, B, T] int32, sent_lengths: [2, B] int32, orders: [2, B].

    `orders` is accepted for interface parity but (as in the PyTorch forward)
    does not influence the returned similarity.
    """
    del orders  # dead code in the original forward
    emb_table = params["embedding"]               # [V, E] f32 (row 0 is zero)
    H = hidden_dim
    S, B, T = sentences.shape

    # ---- pad the batch to a multiple of 8 (f32 sublane count) ----
    Bp = ((B + 7) // 8) * 8
    padb = Bp - B
    sent_p = sentences
    lens_p = sent_lengths.astype(jnp.int32)
    if padb:
        sent_p = jnp.pad(sent_p, ((0, 0), (0, padb), (0, 0)))
        lens_p = jnp.pad(lens_p, ((0, 0), (0, padb)))

    # ---- gate reorder (i,f,g,o) -> (i,f,o,g) and x2 on the g columns so one
    #      sigmoid pass recovers tanh(g) = 2*sigmoid(2g) - 1 ----
    def regate(w):
        i, f, g, o = (w[..., 0:H], w[..., H:2 * H],
                      w[..., 2 * H:3 * H], w[..., 3 * H:4 * H])
        return jnp.concatenate([i, f, o, 2.0 * g], axis=-1)

    # ---- pre-project the embedding table and gather projected rows per token:
    #      proj[s] = E @ W_ih[s] + b[s]  -> kernel receives xp directly ----
    xs = []
    for s in range(2):
        proj = emb_table @ regate(params["w_ih"][s]) + regate(params["bias"][s])
        xs.append(jnp.take(proj, sent_p[s], axis=0))          # [Bp, T, 4H] f32

    # merged, gate-major column layout [i0 i1 | f0 f1 | o0 o1 | g0 g1]
    x0 = xs[0].reshape(Bp, T, 4, H)
    x1 = xs[1].reshape(Bp, T, 4, H)
    xp = jnp.stack([x0, x1], axis=3).reshape(Bp, T, 8 * H)
    xp = jnp.transpose(xp, (1, 0, 2)).astype(jnp.bfloat16)     # [T, Bp, 8H]

    # pad T to a multiple of the time block; padded steps have xp = 0 and can
    # never match `last`, so they do not affect the output
    TB = max(1, min(t_block, T))
    Tp = ((T + TB - 1) // TB) * TB
    if Tp != T:
        xp = jnp.pad(xp, ((0, Tp - T), (0, 0), (0, 0)))

    # block-diagonal recurrent weights in the same merged column layout
    w0 = regate(params["w_hh"][0]).reshape(H, 4, H)
    w1 = regate(params["w_hh"][1]).reshape(H, 4, H)
    wbd = jnp.zeros((2 * H, 4, 2, H), jnp.float32)
    wbd = wbd.at[0:H, :, 0, :].set(w0).at[H:2 * H, :, 1, :].set(w1)
    wbd = wbd.reshape(2 * H, 8 * H).astype(jnp.bfloat16)       # [2H, 8H]

    # per-row (length - 1), pre-broadcast lane-dense across each chain's half
    last = jnp.concatenate(
        [jnp.broadcast_to((lens_p[0] - 1)[:, None], (Bp, H)),
         jnp.broadcast_to((lens_p[1] - 1)[:, None], (Bp, H))],
        axis=1).astype(jnp.int32)                              # [Bp, 2H]

    kernel = functools.partial(_malstm_kernel, TB=TB, H=H)
    out = pl.pallas_call(
        kernel,
        out_shape=jax.ShapeDtypeStruct((Bp, 1), jnp.float32),
        grid=(Tp // TB,),
        in_specs=[
            pl.BlockSpec((TB, Bp, 8 * H), lambda t: (t, 0, 0)),   # xp (streamed)
            pl.BlockSpec((Bp, 2 * H), lambda t: (0, 0)),          # last
            pl.BlockSpec((2 * H, 8 * H), lambda t: (0, 0)),       # W_bd
        ],
        out_specs=pl.BlockSpec((Bp, 1), lambda t: (0, 0)),
        scratch_shapes=[pltpu.VMEM((Bp, 2 * H), jnp.float32),     # h
                        pltpu.VMEM((Bp, 2 * H), jnp.float32),     # c
                        pltpu.VMEM((Bp, 2 * H), jnp.float32)],    # h_last
        compiler_params=pltpu.CompilerParams(
            dimension_semantics=("arbitrary",)),                  # serial over T
    )(xp, last, wbd)
    return out[:B, 0]


# ------------------------ deterministic parameter init ----------------------


def init_params(key, vocab_size, embed_dim, hidden_dim):
    k_emb, k_wih, k_whh, k_bih, k_bhh = jax.random.split(key, 5)
    emb = jax.random.normal(k_emb, (vocab_size, embed_dim), jnp.float32)
    emb = emb.at[0].set(0.0)                    # padding_idx=0
    bound = 1.0 / (hidden_dim ** 0.5)           # PyTorch LSTM default init
    w_ih = jax.random.uniform(k_wih, (2, embed_dim, 4 * hidden_dim),
                              jnp.float32, -bound, bound)
    w_hh = jax.random.uniform(k_whh, (2, hidden_dim, 4 * hidden_dim),
                              jnp.float32, -bound, bound)
    b_ih = jax.random.uniform(k_bih, (2, 1, 4 * hidden_dim),
                              jnp.float32, -bound, bound)
    b_hh = jax.random.uniform(k_bhh, (2, 1, 4 * hidden_dim),
                              jnp.float32, -bound, bound)
    return {"embedding": emb, "w_ih": w_ih, "w_hh": w_hh, "bias": b_ih + b_hh}


# ------------------------------- reference ----------------------------------


def malstm_reference(sentences, sent_lengths, params, *, hidden_dim):
    """Pure-JAX f32 reference in the original PyTorch (i, f, g, o) gate order."""
    emb_table = params["embedding"]
    H = hidden_dim
    _, B, T = sentences.shape
    embeds = emb_table[sentences]               # [2, B, T, E] f32
    h_out = []
    for s in range(2):
        w_ih = params["w_ih"][s]
        w_hh = params["w_hh"][s]
        b = params["bias"][s]
        h = jnp.zeros((B, H), jnp.float32)
        c = jnp.zeros((B, H), jnp.float32)
        h_last = jnp.zeros((B, H), jnp.float32)
        for t in range(T):
            x_t = embeds[s, :, t, :]
            gates = x_t @ w_ih + h @ w_hh + b
            i_g = jax.nn.sigmoid(gates[:, 0:H])
            f_g = jax.nn.sigmoid(gates[:, H:2 * H])
            g_g = jnp.tanh(gates[:, 2 * H:3 * H])
            o_g = jax.nn.sigmoid(gates[:, 3 * H:4 * H])
            c = f_g * c + i_g * g_g
            h = o_g * jnp.tanh(c)
            mask = (sent_lengths[s] - 1 == t)[:, None]
            h_last = jnp.where(mask, h, h_last)
        h_out.append(h_last)
    l1 = jnp.sum(jnp.abs(h_out[0] - h_out[1] + 1e-6), axis=-1)
    return jnp.exp(-l1)


# --------------------------------- main --------------------------------------


if __name__ == "__main__":
    VOCAB, EMBED, HIDDEN = 50, 16, 32
    B, T = 4, 8

    key = jax.random.PRNGKey(0)
    k_p, k_s = jax.random.split(key)
    params = init_params(k_p, VOCAB, EMBED, HIDDEN)

    # token ids >= 1 (0 is padding); rows padded past their length with 0
    sentences = jax.random.randint(k_s, (2, B, T), 1, VOCAB, dtype=jnp.int32)
    sent_lengths = jnp.array([[8, 6, 5, 3], [7, 7, 4, 2]], dtype=jnp.int32)
    t_idx = jnp.arange(T)[None, None, :]
    sentences = jnp.where(t_idx < sent_lengths[:, :, None], sentences, 0)
    orders = jnp.array([[0, 1, 2, 3], [1, 0, 3, 2]], dtype=jnp.int32)

    out = malstm_forward(sentences, sent_lengths, orders, params,
                         hidden_dim=HIDDEN, t_block=4)   # T=8 -> grid=(2,)
    out = jax.block_until_ready(out)

    ref = malstm_reference(sentences, sent_lengths, params, hidden_dim=HIDDEN)
    assert out.shape == (B,)
    assert bool(jnp.all(out > 0)), out
    # The kernel runs the matmuls / xp in bf16 (f32 accumulation), so compare
    # the underlying L1 distances (log space) with a bf16-sized tolerance.
    log_err = float(jnp.max(jnp.abs(jnp.log(out) - jnp.log(ref))))
    assert log_err < 0.2, (out, ref, log_err)

    print("KERNEL_OK")
</pallas_src>

<mosaic_0001>
module attributes {stable_mosaic.version = 11 : i64} {
  func.func @_malstm_kernel(%arg0: i32, %arg1: memref<4x8x256xbf16, #tpu.memory_space<vmem>>, %arg2: memref<8x64xi32, #tpu.memory_space<vmem>>, %arg3: memref<64x256xbf16, #tpu.memory_space<vmem>>, %arg4: memref<8x1xf32, #tpu.memory_space<vmem>>, %arg5: memref<8x64xf32, #tpu.memory_space<vmem>>, %arg6: memref<8x64xf32, #tpu.memory_space<vmem>>, %arg7: memref<8x64xf32, #tpu.memory_space<vmem>>) attributes {dimension_semantics = [#tpu.dimension_semantics<arbitrary>], iteration_bounds = array<i64: 2>, scalar_prefetch = 0 : i64, scratch_operands = 3 : i64, tpu.core_type = #tpu.core_type<tc>, window_params = [{transform_indices = @transform_0, window_bounds = array<i64: 4, 8, 256>}, {pipeline_mode = #tpu.pipeline_mode<synchronous>, transform_indices = @transform_1, window_bounds = array<i64: 8, 64>}, {pipeline_mode = #tpu.pipeline_mode<synchronous>, transform_indices = @transform_2, window_bounds = array<i64: 64, 256>}, {pipeline_mode = #tpu.pipeline_mode<synchronous>, transform_indices = @transform_3, window_bounds = array<i64: 8, 1>}]} {
    %c0_i32 = arith.constant 0 : i32
    %0 = arith.cmpi eq, %arg0, %c0_i32 : i32
    %1 = arith.extui %0 : i1 to i32
    %c0_i32_0 = arith.constant 0 : i32
    %2 = arith.cmpi ne, %1, %c0_i32_0 : i32
    scf.if %2 {
      %cst_43 = arith.constant 0.000000e+00 : f32
      %131 = vector.broadcast %cst_43 : f32 to vector<8x64xf32>
      %c0_44 = arith.constant 0 : index
      %c0_45 = arith.constant 0 : index
      %132 = vector.load %arg5[%c0_44, %c0_45] : memref<8x64xf32, #tpu.memory_space<vmem>>, vector<8x64xf32>
      tpu.vector_store %arg5[%c0_44, %c0_45], %131 {strides = array<i32>} : memref<8x64xf32, #tpu.memory_space<vmem>>, vector<8x64xf32>,
      %cst_46 = arith.constant 0.000000e+00 : f32
      %133 = vector.broadcast %cst_46 : f32 to vector<8x64xf32>
      %c0_47 = arith.constant 0 : index
      %c0_48 = arith.constant 0 : index
      %134 = vector.load %arg6[%c0_47, %c0_48] : memref<8x64xf32, #tpu.memory_space<vmem>>, vector<8x64xf32>
      tpu.vector_store %arg6[%c0_47, %c0_48], %133 {strides = array<i32>} : memref<8x64xf32, #tpu.memory_space<vmem>>, vector<8x64xf32>,
      %cst_49 = arith.constant 0.000000e+00 : f32
      %135 = vector.broadcast %cst_49 : f32 to vector<8x64xf32>
      %c0_50 = arith.constant 0 : index
      %c0_51 = arith.constant 0 : index
      %136 = vector.load %arg7[%c0_50, %c0_51] : memref<8x64xf32, #tpu.memory_space<vmem>>, vector<8x64xf32>
      tpu.vector_store %arg7[%c0_50, %c0_51], %135 {strides = array<i32>} : memref<8x64xf32, #tpu.memory_space<vmem>>, vector<8x64xf32>,
    } else {
    }
    %c0 = arith.constant 0 : index
    %c0_1 = arith.constant 0 : index
    %3 = vector.load %arg3[%c0, %c0_1] : memref<64x256xbf16, #tpu.memory_space<vmem>>, vector<64x256xbf16>
    %c0_2 = arith.constant 0 : index
    %c0_3 = arith.constant 0 : index
    %4 = vector.load %arg2[%c0_2, %c0_3] : memref<8x64xi32, #tpu.memory_space<vmem>>, vector<8x64xi32>
    %c4_i32 = arith.constant 4 : i32
    %5 = arith.muli %arg0, %c4_i32 : i32
    %c0_4 = arith.constant 0 : index
    %c0_5 = arith.constant 0 : index
    %6 = vector.load %arg5[%c0_4, %c0_5] : memref<8x64xf32, #tpu.memory_space<vmem>>, vector<8x64xf32>
    %c0_6 = arith.constant 0 : index
    %c0_7 = arith.constant 0 : index
    %7 = vector.load %arg6[%c0_6, %c0_7] : memref<8x64xf32, #tpu.memory_space<vmem>>, vector<8x64xf32>
    %c0_8 = arith.constant 0 : index
    %c0_9 = arith.constant 0 : index
    %8 = vector.load %arg7[%c0_8, %c0_9] : memref<8x64xf32, #tpu.memory_space<vmem>>, vector<8x64xf32>
    %c0_i32_10 = arith.constant 0 : i32
    %9 = arith.truncf %6 : vector<8x64xf32> to vector<8x64xbf16>
    %cst = arith.constant dense<0.000000e+00> : vector<8x256xf32>
    %10 = tpu.matmul %9, %3, %cst {dimension_numbers = #tpu.dot_dimension_numbers<[1], [0], [0], [1], [0, 0, 1, 1], [], []>} : vector<8x64xbf16>, vector<64x256xbf16>, vector<8x256xf32> -> vector<8x256xf32>
    %11 = arith.index_cast %c0_i32_10 : i32 to index
    %c0_11 = arith.constant 0 : index
    %c0_12 = arith.constant 0 : index
    %12 = vector.load %arg1[%11, %c0_11, %c0_12] : memref<4x8x256xbf16, #tpu.memory_space<vmem>>, vector<1x8x256xbf16>
    %13 = vector.shape_cast %12 : vector<1x8x256xbf16> to vector<8x256xbf16>
    %14 = arith.extf %13 : vector<8x256xbf16> to vector<8x256xf32>
    %15 = arith.addf %10, %14 : vector<8x256xf32>
    %16 = arith.negf %15 : vector<8x256xf32>
    %17 = math.exp %16 : vector<8x256xf32>
    %cst_13 = arith.constant 1.000000e+00 : f32
    %18 = vector.broadcast %cst_13 : f32 to vector<8x256xf32>
    %19 = arith.addf %18, %17 : vector<8x256xf32>
    %20 = arith.divf %18, %19 : vector<8x256xf32>
    %21 = vector.extract_strided_slice %20 {offsets = [0, 0], sizes = [8, 64], strides = [1, 1]} : vector<8x256xf32> to vector<8x64xf32>
    %22 = vector.extract_strided_slice %20 {offsets = [0, 64], sizes = [8, 64], strides = [1, 1]} : vector<8x256xf32> to vector<8x64xf32>
    %23 = vector.extract_strided_slice %20 {offsets = [0, 128], sizes = [8, 64], strides = [1, 1]} : vector<8x256xf32> to vector<8x64xf32>
    %24 = vector.extract_strided_slice %20 {offsets = [0, 192], sizes = [8, 64], strides = [1, 1]} : vector<8x256xf32> to vector<8x64xf32>
    %cst_14 = arith.constant 2.000000e+00 : f32
    %25 = vector.broadcast %cst_14 : f32 to vector<8x64xf32>
    %26 = arith.mulf %25, %24 : vector<8x64xf32>
    %cst_15 = arith.constant 1.000000e+00 : f32
    %27 = vector.broadcast %cst_15 : f32 to vector<8x64xf32>
    %28 = arith.subf %26, %27 : vector<8x64xf32>
    %29 = arith.mulf %22, %7 : vector<8x64xf32>
    %30 = arith.mulf %21, %28 : vector<8x64xf32>
    %31 = arith.addf %29, %30 : vector<8x64xf32>
    %32 = math.tanh %31 : vector<8x64xf32>
    %33 = arith.mulf %23, %32 : vector<8x64xf32>
    %34 = arith.addi %5, %c0_i32_10 : i32
    %35 = vector.broadcast %34 : i32 to vector<8x64xi32>
    %36 = arith.cmpi eq, %4, %35 : vector<8x64xi32>
    %37 = arith.select %36, %33, %8 : vector<8x64xi1>, vector<8x64xf32>
    %c1_i32 = arith.constant 1 : i32
    %38 = arith.truncf %33 : vector<8x64xf32> to vector<8x64xbf16>
    %cst_16 = arith.constant dense<0.000000e+00> : vector<8x256xf32>
    %39 = tpu.matmul %38, %3, %cst_16 {dimension_numbers = #tpu.dot_dimension_numbers<[1], [0], [0], [1], [0, 0, 1, 1], [], []>} : vector<8x64xbf16>, vector<64x256xbf16>, vector<8x256xf32> -> vector<8x256xf32>
    %40 = arith.index_cast %c1_i32 : i32 to index
    %c0_17 = arith.constant 0 : index
    %c0_18 = arith.constant 0 : index
    %41 = vector.load %arg1[%40, %c0_17, %c0_18] : memref<4x8x256xbf16, #tpu.memory_space<vmem>>, vector<1x8x256xbf16>
    %42 = vector.shape_cast %41 : vector<1x8x256xbf16> to vector<8x256xbf16>
    %43 = arith.extf %42 : vector<8x256xbf16> to vector<8x256xf32>
    %44 = arith.addf %39, %43 : vector<8x256xf32>
    %45 = arith.negf %44 : vector<8x256xf32>
    %46 = math.exp %45 : vector<8x256xf32>
    %cst_19 = arith.constant 1.000000e+00 : f32
    %47 = vector.broadcast %cst_19 : f32 to vector<8x256xf32>
    %48 = arith.addf %47, %46 : vector<8x256xf32>
    %49 = arith.divf %47, %48 : vector<8x256xf32>
    %50 = vector.extract_strided_slice %49 {offsets = [0, 0], sizes = [8, 64], strides = [1, 1]} : vector<8x256xf32> to vector<8x64xf32>
    %51 = vector.extract_strided_slice %49 {offsets = [0, 64], sizes = [8, 64], strides = [1, 1]} : vector<8x256xf32> to vector<8x64xf32>
    %52 = vector.extract_strided_slice %49 {offsets = [0, 128], sizes = [8, 64], strides = [1, 1]} : vector<8x256xf32> to vector<8x64xf32>
    %53 = vector.extract_strided_slice %49 {offsets = [0, 192], sizes = [8, 64], strides = [1, 1]} : vector<8x256xf32> to vector<8x64xf32>
    %cst_20 = arith.constant 2.000000e+00 : f32
    %54 = vector.broadcast %cst_20 : f32 to vector<8x64xf32>
    %55 = arith.mulf %54, %53 : vector<8x64xf32>
    %cst_21 = arith.constant 1.000000e+00 : f32
    %56 = vector.broadcast %cst_21 : f32 to vector<8x64xf32>
    %57 = arith.subf %55, %56 : vector<8x64xf32>
    %58 = arith.mulf %51, %31 : vector<8x64xf32>
    %59 = arith.mulf %50, %57 : vector<8x64xf32>
    %60 = arith.addf %58, %59 : vector<8x64xf32>
    %61 = math.tanh %60 : vector<8x64xf32>
    %62 = arith.mulf %52, %61 : vector<8x64xf32>
    %63 = arith.addi %5, %c1_i32 : i32
    %64 = vector.broadcast %63 : i32 to vector<8x64xi32>
    %65 = arith.cmpi eq, %4, %64 : vector<8x64xi32>
    %66 = arith.select %65, %62, %37 : vector<8x64xi1>, vector<8x64xf32>
    %c2_i32 = arith.constant 2 : i32
    %67 = arith.truncf %62 : vector<8x64xf32> to vector<8x64xbf16>
    %cst_22 = arith.constant dense<0.000000e+00> : vector<8x256xf32>
    %68 = tpu.matmul %67, %3, %cst_22 {dimension_numbers = #tpu.dot_dimension_numbers<[1], [0], [0], [1], [0, 0, 1, 1], [], []>} : vector<8x64xbf16>, vector<64x256xbf16>, vector<8x256xf32> -> vector<8x256xf32>
    %69 = arith.index_cast %c2_i32 : i32 to index
    %c0_23 = arith.constant 0 : index
    %c0_24 = arith.constant 0 : index
    %70 = vector.load %arg1[%69, %c0_23, %c0_24] : memref<4x8x256xbf16, #tpu.memory_space<vmem>>, vector<1x8x256xbf16>
    %71 = vector.shape_cast %70 : vector<1x8x256xbf16> to vector<8x256xbf16>
    %72 = arith.extf %71 : vector<8x256xbf16> to vector<8x256xf32>
    %73 = arith.addf %68, %72 : vector<8x256xf32>
    %74 = arith.negf %73 : vector<8x256xf32>
    %75 = math.exp %74 : vector<8x256xf32>
    %cst_25 = arith.constant 1.000000e+00 : f32
    %76 = vector.broadcast %cst_25 : f32 to vector<8x256xf32>
    %77 = arith.addf %76, %75 : vector<8x256xf32>
    %78 = arith.divf %76, %77 : vector<8x256xf32>
    %79 = vector.extract_strided_slice %78 {offsets = [0, 0], sizes = [8, 64], strides = [1, 1]} : vector<8x256xf32> to vector<8x64xf32>
    %80 = vector.extract_strided_slice %78 {offsets = [0, 64], sizes = [8, 64], strides = [1, 1]} : vector<8x256xf32> to vector<8x64xf32>
    %81 = vector.extract_strided_slice %78 {offsets = [0, 128], sizes = [8, 64], strides = [1, 1]} : vector<8x256xf32> to vector<8x64xf32>
    %82 = vector.extract_strided_slice %78 {offsets = [0, 192], sizes = [8, 64], strides = [1, 1]} : vector<8x256xf32> to vector<8x64xf32>
    %cst_26 = arith.constant 2.000000e+00 : f32
    %83 = vector.broadcast %cst_26 : f32 to vector<8x64xf32>
    %84 = arith.mulf %83, %82 : vector<8x64xf32>
    %cst_27 = arith.constant 1.000000e+00 : f32
    %85 = vector.broadcast %cst_27 : f32 to vector<8x64xf32>
    %86 = arith.subf %84, %85 : vector<8x64xf32>
    %87 = arith.mulf %80, %60 : vector<8x64xf32>
    %88 = arith.mulf %79, %86 : vector<8x64xf32>
    %89 = arith.addf %87, %88 : vector<8x64xf32>
    %90 = math.tanh %89 : vector<8x64xf32>
    %91 = arith.mulf %81, %90 : vector<8x64xf32>
    %92 = arith.addi %5, %c2_i32 : i32
    %93 = vector.broadcast %92 : i32 to vector<8x64xi32>
    %94 = arith.cmpi eq, %4, %93 : vector<8x64xi32>
    %95 = arith.select %94, %91, %66 : vector<8x64xi1>, vector<8x64xf32>
    %c3_i32 = arith.constant 3 : i32
    %96 = arith.truncf %91 : vector<8x64xf32> to vector<8x64xbf16>
    %cst_28 = arith.constant dense<0.000000e+00> : vector<8x256xf32>
    %97 = tpu.matmul %96, %3, %cst_28 {dimension_numbers = #tpu.dot_dimension_numbers<[1], [0], [0], [1], [0, 0, 1, 1], [], []>} : vector<8x64xbf16>, vector<64x256xbf16>, vector<8x256xf32> -> vector<8x256xf32>
    %98 = arith.index_cast %c3_i32 : i32 to index
    %c0_29 = arith.constant 0 : index
    %c0_30 = arith.constant 0 : index
    %99 = vector.load %arg1[%98, %c0_29, %c0_30] : memref<4x8x256xbf16, #tpu.memory_space<vmem>>, vector<1x8x256xbf16>
    %100 = vector.shape_cast %99 : vector<1x8x256xbf16> to vector<8x256xbf16>
    %101 = arith.extf %100 : vector<8x256xbf16> to vector<8x256xf32>
    %102 = arith.addf %97, %101 : vector<8x256xf32>
    %103 = arith.negf %102 : vector<8x256xf32>
    %104 = math.exp %103 : vector<8x256xf32>
    %cst_31 = arith.constant 1.000000e+00 : f32
    %105 = vector.broadcast %cst_31 : f32 to vector<8x256xf32>
    %106 = arith.addf %105, %104 : vector<8x256xf32>
    %107 = arith.divf %105, %106 : vector<8x256xf32>
    %108 = vector.extract_strided_slice %107 {offsets = [0, 0], sizes = [8, 64], strides = [1, 1]} : vector<8x256xf32> to vector<8x64xf32>
    %109 = vector.extract_strided_slice %107 {offsets = [0, 64], sizes = [8, 64], strides = [1, 1]} : vector<8x256xf32> to vector<8x64xf32>
    %110 = vector.extract_strided_slice %107 {offsets = [0, 128], sizes = [8, 64], strides = [1, 1]} : vector<8x256xf32> to vector<8x64xf32>
    %111 = vector.extract_strided_slice %107 {offsets = [0, 192], sizes = [8, 64], strides = [1, 1]} : vector<8x256xf32> to vector<8x64xf32>
    %cst_32 = arith.constant 2.000000e+00 : f32
    %112 = vector.broadcast %cst_32 : f32 to vector<8x64xf32>
    %113 = arith.mulf %112, %111 : vector<8x64xf32>
    %cst_33 = arith.constant 1.000000e+00 : f32
    %114 = vector.broadcast %cst_33 : f32 to vector<8x64xf32>
    %115 = arith.subf %113, %114 : vector<8x64xf32>
    %116 = arith.mulf %109, %89 : vector<8x64xf32>
    %117 = arith.mulf %108, %115 : vector<8x64xf32>
    %118 = arith.addf %116, %117 : vector<8x64xf32>
    %119 = math.tanh %118 : vector<8x64xf32>
    %120 = arith.mulf %110, %119 : vector<8x64xf32>
    %121 = arith.addi %5, %c3_i32 : i32
    %122 = vector.broadcast %121 : i32 to vector<8x64xi32>
    %123 = arith.cmpi eq, %4, %122 : vector<8x64xi32>
    %124 = arith.select %123, %120, %95 : vector<8x64xi1>, vector<8x64xf32>
    %c4_i32_34 = arith.constant 4 : i32
    %c0_35 = arith.constant 0 : index
    %c0_36 = arith.constant 0 : index
    %125 = vector.load %arg5[%c0_35, %c0_36] : memref<8x64xf32, #tpu.memory_space<vmem>>, vector<8x64xf32>
    tpu.vector_store %arg5[%c0_35, %c0_36], %120 {strides = array<i32>} : memref<8x64xf32, #tpu.memory_space<vmem>>, vector<8x64xf32>,
    %c0_37 = arith.constant 0 : index
    %c0_38 = arith.constant 0 : index
    %126 = vector.load %arg6[%c0_37, %c0_38] : memref<8x64xf32, #tpu.memory_space<vmem>>, vector<8x64xf32>
    tpu.vector_store %arg6[%c0_37, %c0_38], %118 {strides = array<i32>} : memref<8x64xf32, #tpu.memory_space<vmem>>, vector<8x64xf32>,
    %c0_39 = arith.constant 0 : index
    %c0_40 = arith.constant 0 : index
    %127 = vector.load %arg7[%c0_39, %c0_40] : memref<8x64xf32, #tpu.memory_space<vmem>>, vector<8x64xf32>
    tpu.vector_store %arg7[%c0_39, %c0_40], %124 {strides = array<i32>} : memref<8x64xf32, #tpu.memory_space<vmem>>, vector<8x64xf32>,
    %c1_i32_41 = arith.constant 1 : i32
    %128 = arith.cmpi eq, %arg0, %c1_i32_41 : i32
    %129 = arith.extui %128 : i1 to i32
    %c0_i32_42 = arith.constant 0 : i32
    %130 = arith.cmpi ne, %129, %c0_i32_42 : i32
    scf.if %130 {
      %131 = vector.extract_strided_slice %124 {offsets = [0, 0], sizes = [8, 32], strides = [1, 1]} : vector<8x64xf32> to vector<8x32xf32>
      %132 = vector.extract_strided_slice %124 {offsets = [0, 32], sizes = [8, 32], strides = [1, 1]} : vector<8x64xf32> to vector<8x32xf32>
      %133 = arith.subf %131, %132 : vector<8x32xf32>
      %cst_43 = arith.constant 9.99999997E-7 : f32
      %134 = vector.broadcast %cst_43 : f32 to vector<8x32xf32>
      %135 = arith.addf %133, %134 : vector<8x32xf32>
      %136 = math.absf %135 : vector<8x32xf32>
      %cst_44 = arith.constant dense<0.000000e+00> : vector<8xf32>
      %137 = vector.multi_reduction <add>, %136, %cst_44 [1] : vector<8x32xf32> to vector<8xf32>
      %138 = vector.shape_cast %137 : vector<8xf32> to vector<8x1xf32>
      %cst_45 = arith.constant 0.000000e+00 : f32
      %139 = vector.broadcast %cst_45 : f32 to vector<8x1xf32>
      %140 = arith.subf %139, %138 : vector<8x1xf32>
      %141 = math.exp %140 : vector<8x1xf32>
      %c0_46 = arith.constant 0 : index
      %c0_47 = arith.constant 0 : index
      %142 = vector.load %arg4[%c0_46, %c0_47] : memref<8x1xf32, #tpu.memory_space<vmem>>, vector<8x1xf32>
      tpu.vector_store %arg4[%c0_46, %c0_47], %141 {strides = array<i32>} : memref<8x1xf32, #tpu.memory_space<vmem>>, vector<8x1xf32>,
    } else {
    }
    return
  }
  func.func @transform_0(%arg0: i32) -> (i32, i32, i32) {
    %c0_i32 = arith.constant 0 : i32
    %c0_i32_0 = arith.constant 0 : i32
    %c0_i32_1 = arith.constant 0 : i32
    return %arg0, %c0_i32, %c0_i32_0 : i32, i32, i32
  }
  func.func @transform_1(%arg0: i32) -> (i32, i32) {
    %c0_i32 = arith.constant 0 : i32
    %c0_i32_0 = arith.constant 0 : i32
    %c0_i32_1 = arith.constant 0 : i32
    return %c0_i32, %c0_i32_0 : i32, i32
  }
  func.func @transform_2(%arg0: i32) -> (i32, i32) {
    %c0_i32 = arith.constant 0 : i32
    %c0_i32_0 = arith.constant 0 : i32
    %c0_i32_1 = arith.constant 0 : i32
    return %c0_i32, %c0_i32_0 : i32, i32
  }
  func.func @transform_3(%arg0: i32) -> (i32, i32) {
    %c0_i32 = arith.constant 0 : i32
    %c0_i32_0 = arith.constant 0 : i32
    %c0_i32_1 = arith.constant 0 : i32
    return %c0_i32, %c0_i32_0 : i32, i32
  }
}

</mosaic_0001>

<bundles_post_ra>
// kernel: tpu_custom_call.1
= control target key start
LH: loop header
LB: loop body
LE: loop exit
PB: predicated region body
PF: predicated region fallthrough
CT: control target
= control target key end

     0   :  { %8 = vsyncpa [#allocation6], 0  ;;  %s1288_s0 = inlined_call_operand.hbm [shape: bf16[8,8,256], index: 0, kind: input, shape index: {}]   ;;  %s1289_s1 = inlined_call_operand.hbm [shape: s32[8,64], index: 1, kind: input, shape index: {}]   ;;  %s1290_s2 = inlined_call_operand.hbm [shape: bf16[64,256], index: 2, kind: input, shape index: {}]   ;;  %s1291_s3 = inlined_call_operand.vmem [shape: f32[8,1], index: 3, kind: output, shape index: {}]  }
   0x1   :  { %10 = vsyncpa [#allocation6 + $0x1], 0 }
   0x2   :  { %11 = vsyncpa [#allocation8], 0  ;;  %s1013_s12 = smov 0   ;;  %s1015_s13 = smov 0  }
   0x3   :  { %s1017_s14 = smov 0   ;;  %s1019_s15 = smov 0  }
   0x4 LB: > { %s1032_s16 = sadd.s32 4294967295, %s982_s15   ;;  %s1035_s17 = sadd.s32 1, %s982_s15   ;;  %s982_s15 = sphi %s1019_s15, %s1310_s15   ;;  %s978_s14 = sphi %s1017_s14, %s1309_s14   ;;  %s974_s13 = sphi %s1015_s13, %s1308_s13   ;;  %s970_s12 = sphi %s1013_s12, %s1307_s12  }
   0x5   : > { %s21_s18 = ssub.s32 %s982_s15, %s1035_s17  ;;  %s24_s19 = sadd.s32 1, %s978_s14 }
   0x6   : > { %p22_p0 = scmp.eq.s32.totalorder %s21_s18, 0  ;;  %p31_p1 = scmp.ne.s32.totalorder %s978_s14, %s974_s13 }
   0x7   : > { %p32_p2 = scmp.eq.s32.totalorder %s982_s15, 0  ;;  %p37_p3 = scmp.ne.s32.totalorder %s974_s13, %s970_s12 }
   0x8   : > { %s1045_s20 = scalar_select %p22_p0, %s978_s14, %s24_s19  }
   0x9   : > { %p1047_p4 = por %p32_p2, %p31_p1  ;;  %p1292_p5 = scmp.eq.s32.totalorder %s1032_s16, 0 }
   0xa   : > { %p692_p6 = scmp.ge.s32.totalorder %s982_s15, 1  ;;  %p111_p7 = scmp.lt.s32.totalorder %s982_s15, 3 }
   0xb   : > { %p1056_p8 = por %p1292_p5, %p37_p3  ;;  %s984_s24 = smov [#allocation7]  }
   0xc   : > { %p1061_p10 = pnand %p692_p6, %p111_p7  ;;  %s124_s25 = sshll.u32 %s984_s24, 4  ;;  %s125_s25 = int_to_ptr.vmem [resolvable:$true] %s124_s25 }
   0xd   : > { %s1297_s22 = scalar_select %p1056_p8, 1, 0 }
   0xe   : > { %s1298_s23 = scalar_select %p1061_p10, 1, 0 }
   0xf   : > { %p748_p11 = pneg %p1061_p10  ;;  %p761_p12 = scmp.lt.s32.totalorder %s982_s15, 2 }
  0x10   : > { %s985_s27 = smov [#allocation9]   ;;  %s858_s5 = scalar_lea.hbm %s1289_s1, 128 }
  0x11   : > { %p1070_p13 = pnand %p748_p11, %p1292_p5  ;;  %s134_s28 = sshll.u32 %s985_s27, 4  ;;  %s1080_s28 = int_to_ptr.vmem [resolvable:$true] %s134_s28 }
  0x12   : > { %p1076_p0 = pnand %p761_p12, %p1047_p4  ;;  %p859_p1 = scmp.ne.s32.totalorder %s1289_s1, %s858_s5 }
  0x13   : > { %p860_p2 = pneg %p1070_p13  ;;  %p865_p4 = scmp.lt.u32.totalorder %s858_s5, %s1289_s1 }
  0x14   : > { %s1300_s29 = scalar_select %p1076_p0, 1, 0 }
  0x15   : > { %p861_p3 = pnand %p860_p2, %p859_p1 }
  0x17   : > { %p862_p6 = pneg %p861_p3 }
  0x19   : > { %p867_p7 = pnand %p865_p4, %p862_p6 }
  0x1b   : > { %870 = shalt.err (!%p867_p7)
}
  0x1c   : > { %s871_s10 = scalar_lea.vmem %s125_s25, 128  ;;  %p879_p5 = scmp.lt.s32.totalorder %s125_s25, %s125_s25 }
  0x1d   : > { %p872_p11 = scmp.ne.s32.totalorder %s125_s25, %s871_s10  ;;  %p880_p8 = scmp.lt.s32.totalorder %s871_s10, %s871_s10 }
  0x1f   : > { %p874_p12 = pnand %p872_p11, %p860_p2  ;;  %p881_p10 = por %p880_p8, %p879_p5 }
  0x21   : > { %p875_p9 = pneg %p874_p12 }
  0x23   : > { %p882_p0 = pnand %p881_p10, %p875_p9 }
  0x25   : > { %885 = shalt.err (!%p882_p0)
}
  0x26   : > { %751 = dma.hbm_to_vmem [thread:$0]  (!%p1070_p13), %s1289_s1, 128, %s125_s25, [#allocation8]  }
  0x27   : > { %s886_s21 = scalar_lea.hbm %s1290_s2, 1024 }
  0x28   : > { %p887_p1 = scmp.ne.s32.totalorder %s1290_s2, %s886_s21  ;;  %p893_p9 = scmp.lt.u32.totalorder %s886_s21, %s1290_s2 }
  0x2a   : > { %p889_p5 = pnand %p887_p1, %p860_p2 }
  0x2c   : > { %p890_p8 = pneg %p889_p5 }
  0x2e   : > { %p895_p10 = pnand %p893_p9, %p890_p8 }
  0x30   : > { %898 = shalt.err (!%p895_p10)
}
  0x31   : > { %s899_s25 = scalar_lea.vmem %s1080_s28, 1024  ;;  %p907_p4 = scmp.lt.s32.totalorder %s1080_s28, %s1080_s28 }
  0x32   : > { %p900_p0 = scmp.ne.s32.totalorder %s1080_s28, %s899_s25  ;;  %p908_p7 = scmp.lt.s32.totalorder %s899_s25, %s899_s25 }
  0x34   : > { %p902_p3 = pnand %p900_p0, %p860_p2  ;;  %p909_p11 = por %p908_p7, %p907_p4 }
  0x36   : > { %p903_p6 = pneg %p902_p3 }
  0x38   : > { %p910_p12 = pnand %p909_p11, %p903_p6 }
  0x3a   : > { %913 = shalt.err (!%p910_p12)
}
  0x3b   : > { %s986_s5 = smov 128   ;;  %s987_s6 = smov 8  }
  0x3c   : > { %754 = dma.hbm_to_vmem [thread:$0]  (!%p1070_p13), %s1290_s2, 1024, %s1080_s28, [#allocation8], %s986_s5, %s986_s5, %s987_s6  }
  0x3d   : > { %s148_s9 = sand.u32 1, %s978_s14   ;;  %s737_s10 = sshll.u32 %s982_s15, 9 }
  0x3e   : > { %s696_s11 = sshll.u32 %s148_s9, 5  ;;  %s1137_s19 = scalar_lea.hbm %s1288_s0, %s737_s10 }
  0x3f   : > { %s152_s26 = scalar_lea.vmem [#allocation5], %s696_s11  ;;  %s1141_s24 = scalar_lea.sflag [#allocation6], %s148_s9 }
  0x40   : > { %s160_s21 = sshll.u32 %s152_s26, 4  ;;  %s914_s27 = scalar_lea.hbm %s1137_s19, 512  ;;  %s1139_s21 = int_to_ptr.vmem [resolvable:$true] %s160_s21 }
  0x41   : > { %p915_p13 = scmp.ne.s32.totalorder %s1137_s19, %s914_s27  ;;  %p1301_p2 = scmp.ne.s32.totalorder %s1300_s29, 0 }
  0x42   : > { %s919_s30 = scalar_lea.hbm %s1288_s0, 1024  ;;  %p920_p9 = scmp.lt.u32.totalorder %s1137_s19, %s1288_s0 }
  0x43   : > { %p916_p1 = pneg %p1301_p2  ;;  %p921_p10 = scmp.lt.u32.totalorder %s919_s30, %s914_s27 }
  0x44   : > { %p923_p3 = scmp.lt.u32.totalorder %s914_s27, %s1137_s19 }
  0x45   : > { %p917_p5 = pnand %p916_p1, %p915_p13  ;;  %p922_p0 = por %p921_p10, %p920_p9 }
  0x47   : > { %p918_p8 = pneg %p917_p5  ;;  %p924_p6 = por %p923_p3, %p922_p0 }
  0x49   : > { %p925_p4 = pnand %p924_p6, %p918_p8 }
  0x4b   : > { %928 = shalt.err (!%p925_p4)
}
  0x4c   : > { %s929_s7 = scalar_lea.vmem %s1139_s21, 512  ;;  %s988_s8 = smov [#allocation5]  }
  0x4d   : > { %p930_p7 = scmp.ne.s32.totalorder %s1139_s21, %s929_s7  ;;  %s934_s9 = sshll.u32 %s988_s8, 4  ;;  %s935_s9 = int_to_ptr.vmem [resolvable:$false] %s934_s9 }
  0x4e   : > { %s936_s10 = scalar_lea.vmem %s935_s9, 1024  ;;  %p937_p13 = scmp.lt.s32.totalorder %s1139_s21, %s935_s9 }
  0x4f   : > { %p932_p11 = pnand %p930_p7, %p916_p1  ;;  %p938_p5 = scmp.lt.s32.totalorder %s936_s10, %s929_s7 }
  0x51   : > { %p933_p12 = pneg %p932_p11  ;;  %p939_p9 = por %p938_p5, %p937_p13 }
  0x53   : > { %p940_p10 = pnand %p939_p9, %p933_p12 }
  0x55   : > { %943 = shalt.err (!%p940_p10)
}
  0x56   : > { %758 = dma.hbm_to_vmem [thread:$0]  (!%p1301_p2), %s1137_s19, 512, %s1139_s21, %s1141_s24, %s986_s5, %s986_s5, %s987_s6  }
  0x57   : > { %p1302_p1 = scmp.ne.s32.totalorder %s1298_s23, 0 }
  0x58   : > { %s174_s11 = sand.u32 (!%p1302_p1), 1, %s974_s13   ;;  %p1303_p8 = scmp.ne.s32.totalorder (!%p1302_p1), %s1297_s22, 0 }
  0x59   : > { %172 = sbr.rel (%p1302_p1) target bundleno = 2842 (0xb1a), region = 32  ;;  %s701_s12 = sshll.u32 (!%p1302_p1), %s174_s11, 5 }
  0x5a   : > { %s175_s18 = scalar_lea.sflag (!%p1302_p1), [#allocation6], %s174_s11  ;;  %s1175_s26 = scalar_lea.vmem (!%p1302_p1), [#allocation5], %s701_s12 }
  0x60   : > { %961 = dma.done.wait (%p1303_p8), %s175_s18, 512  }
  0x61   : > { %963 = vsyncadd (%p1303_p8), %s175_s18, 4294966784  ;;  %p1304_p0 = scmp.eq.s32.totalorder %s1032_s16, 0 }
  0x63   : > { %965 = dma.done.wait (%p1304_p0), [#allocation8], 1152   ;;  %p1305_p2 = pmov %p1304_p0 }
  0x64   : > { %p1306_p3 = scmp.ne.s32.totalorder %s1032_s16, 0 }
  0x65   : > { %967 = vsyncadd (%p1305_p2), [#allocation8], 4294966144  ;;  %vm210_vm0 = vcmask (!%p1306_p3), 523264   ;;  %v989_v0 = vmov (!%p1306_p3), 0.0  }
  0x66   : > { %209 = sbr.rel (%p1306_p3) target bundleno = 109 (0x6d), region = 48  ;;  %211 = vst.msk [vmem:[#allocation2] sm:$0xff] (!%p1306_p3), %vm210_vm0, %v989_v0  ;;  %212 = vst.msk [vmem:[#allocation3] sm:$0xff] (!%p1306_p3), %vm210_vm0, %v989_v0 }
  0x67   : > { %213 = vst.msk [vmem:[#allocation4] sm:$0xff] (!%p1306_p3), %vm210_vm0, %v989_v0 }
  0x6d PF: > { %v804_v1 = vld [vmem:[#allocation9 + $0x4] ss:$8 sps:$4 sm:$0xff]   ;;  %v1187_v2 = vld [vmem:[#allocation9] ss:$8 sps:$4 sm:$0xff]   ;;  %v990_v3 = vmov 0   ;;  %vm271_vm1 = vcmask 523264  }
  0x6e   : > { %307 = vmatprep.mubr.bf16.mxu0 %v990_v3  ;;  %394 = vmatprep.mubr.bf16.mxu1 %v990_v3  ;;  %v1191_v4 = vld [vmem:[#allocation9 + $0x14] ss:$8 sps:$4 sm:$0xff]   ;;  %v1194_v5 = vld [vmem:[#allocation9 + $0x10] ss:$8 sps:$4 sm:$0xff]   ;;  %v1198_v6 = vld [vmem:[#allocation9 + $0x24] ss:$8 sps:$4 sm:$0xff]  }
  0x6f   : > { %275 = vmatprep.subr.bf16.mxu0 %v804_v1  ;;  %362 = vmatprep.subr.bf16.mxu1 %v804_v1  ;;  %v1202_v7 = vld [vmem:[#allocation9 + $0x20] ss:$8 sps:$4 sm:$0xff]   ;;  %v1206_v8 = vld [vmem:[#allocation9 + $0x34] ss:$8 sps:$4 sm:$0xff]   ;;  %v1210_v9 = vld [vmem:[#allocation9 + $0x30] ss:$8 sps:$4 sm:$0xff]  }
  0x70   : > { %276 = vmatpush1.bf16.msra.mxu0 %v1187_v2  ;;  %363 = vmatpush1.bf16.msra.mxu1 %v1187_v2  ;;  %v224_v10 = vld [vmem:[#allocation2] sm:$0xff]  ;;  %v228_v12 = vld [vmem:[%s1175_s26] sm:$0xff]  ;;  %s991_s22 = smov 64   ;;  %v225_v25 = vld [vmem:[#allocation3] sm:$0xff]  ;;  %s1245_s23 = sshll.u32 %s1032_s16, 2 }
  0x71   : > { %277 = vmatprep.subr.bf16.mxu0 %v1191_v4  ;;  %364 = vmatprep.subr.bf16.mxu1 %v1191_v4  ;;  %v227_v11 = vpack.c.bf16 %v224_v10, %v224_v10  ;;  %v230_v13 = vunpack.c.h.bf16 %v228_v12  ;;  %v229_v26 = vunpack.c.l.bf16 %v228_v12  ;;  %v718_v42 = vld [vmem:[%s1175_s26 + $0x8] sm:$0xff]  ;;  %s434_s29 = sadd.s32 1, %s1245_s23  ;;  %v723_v12 = vld [vmem:[%s1175_s26 + $0x10] sm:$0xff]  ;;  %s518_s5 = sadd.s32 2, %s1245_s23 }
  0x72   : > { %v358_v43 = vunpack.c.h.bf16 %v718_v42  ;;  %v357_v55 = vunpack.c.l.bf16 %v718_v42  ;;  %v728_v42 = vld [vmem:[%s1175_s26 + $0x18] sm:$0xff]  ;;  %s602_s6 = sadd.s32 3, %s1245_s23  ;;  %p733_p6 = scmp.ne.s32.totalorder %s1032_s16, 1 }
  0x73   : > { %s992_s19 = smov (!%p733_p6), 96   ;;  %vm624_vm6 = vcmask (!%p733_p6), 261120   ;;  %vm631_vm7 = vcmask (!%p733_p6), 7168  }
  0x74   : > { %278 = vmatpush1.bf16.msra.mxu0 %v1194_v5  ;;  %365 = vmatpush1.bf16.msra.mxu1 %v1194_v5 }
  0x75   : > { %279 = vmatprep.subr.bf16.mxu0 %v1198_v6  ;;  %366 = vmatprep.subr.bf16.mxu1 %v1198_v6 }
  0x78   : > { %280 = vmatpush1.bf16.msra.mxu0 %v1202_v7  ;;  %367 = vmatpush1.bf16.msra.mxu1 %v1202_v7 }
  0x79   : > { %281 = vmatprep.subr.bf16.mxu0 %v1206_v8  ;;  %368 = vmatprep.subr.bf16.mxu1 %v1206_v8 }
  0x7c   : > { %282 = vmatpush1.bf16.msra.mxu0 %v1210_v9  ;;  %369 = vmatpush1.bf16.msra.mxu1 %v1210_v9 }
  0x7d   : > { %446 = vmatprep.subr.bf16.mxu0 %v804_v1  ;;  %530 = vmatprep.subr.bf16.mxu1 %v804_v1 }
  0x7f   : > { %714 = vmatmul.mubr.msk.bf16.vlgmr.msra.gmra.mrb[0].mxu0 %vm271_vm1, %v227_v11 }
  0x80   : > { %447 = vmatpush1.bf16.msra.mxu0 %v1187_v2  ;;  %478 = vmatprep.mubr.bf16.mxu0 %v990_v3 }
  0x81   : > { %448 = vmatprep.subr.bf16.mxu0 %v1191_v4 }
  0x84   : > { %449 = vmatpush1.bf16.msra.mxu0 %v1194_v5 }
  0x85   : > { %450 = vmatprep.subr.bf16.mxu0 %v1198_v6 }
  0x88   : > { %451 = vmatpush1.bf16.msra.mxu0 %v1202_v7 }
  0x89   : > { %452 = vmatprep.subr.bf16.mxu0 %v1206_v8 }
  0x8c   : > { %453 = vmatpush1.bf16.msra.mxu0 %v1210_v9 }
 0x152   : > { %v309_v14 = vpop.f32.mrb[0].mxu0 }
 0x153   : > { %v311_v15 = vpop.f32.mrb[1].mxu0  ;;  %v310_v27 = vadd.f32 %v309_v14, %v229_v26 }
 0x154   : > { %v312_v16 = vadd.f32 %v311_v15, %v230_v13  ;;  %v313_v17 = vpop.f32.mrb[2].mxu0  ;;  %v442_v13 = vunpack.c.h.bf16 %v723_v12 }
 0x155   : > { %v314_v18 = vpop.f32.mrb[3].mxu0  ;;  %v715_v28 = vmul.f32 -1.442695, %v310_v27 }
 0x156   : > { %v716_v19 = vmul.f32 -1.442695, %v312_v16 }
 0x158   : > { %816 = vpow2.f32 %v716_v19 }
 0x162   : > { %v817_v20 = vpop.eup %816 }
 0x163   : > { %v323_v21 = vadd.f32 1.0, %v817_v20 }
 0x165   : > { %818 = vrcp.f32 %v323_v21 }
 0x166   : > { %820 = vpow2.f32 %v715_v28 }
 0x16f   : > { %v819_v22 = vpop.eup %818 }
 0x170   : > { %v328_v23 = vmul.f32 2.0, %v819_v22  ;;  %v821_v29 = vpop.eup %820 }
 0x171   : > { %v322_v30 = vadd.f32 1.0, %v821_v29 }
 0x172   : > { %v717_v24 = vadd.f32 -1.0, %v328_v23 }
 0x173   : > { %822 = vrcp.f32 %v322_v30 }
 0x174   : > { %336 = vrot.lane.b32.xlu0 %v717_v24, %s991_s22 }
 0x178   : > { %331 = vrot.lane.b32.xlu0 %v225_v25, %s991_s22  ;;  %v441_v25 = vunpack.c.l.bf16 %v723_v12 }
 0x17d   : > { %v823_v31 = vpop.eup %822 }
 0x1e6   : > { %v337_v32 = vpop.permute.xlu0 %336 }
 0x1e7   : > { %v339_v33 = vmul.f32 %v823_v31, %v337_v32 }
 0x1e9   : > { %341 = vrot.lane.b32.xlu1 %v339_v33, %s991_s22 }
 0x1ea   : > { %v332_v34 = vpop.permute.xlu0 %331 }
 0x1eb   : > { %v334_v35 = vmul.f32 %v823_v31, %v332_v34 }
 0x25b   : > { %v342_v36 = vpop.permute.xlu1 %341 }
 0x25c   : > { %v344_v37 = vadd.f32 %v342_v36, %v334_v35 }
 0x25e   : > { %824 = vtanh.f32 %v344_v37 }
 0x268   : > { %v825_v38 = vpop.eup %824 }
 0x269   : > { %347 = vrot.lane.b32.xlu1 %v825_v38, %s991_s22 }
 0x2db   : > { %v348_v39 = vpop.permute.xlu1 %347 }
 0x2dc   : > { %v350_v40 = vmul.f32 %v819_v22, %v348_v39 }
 0x2de   : > { %v354_v41 = vpack.c.bf16 %v350_v40, %v350_v40 }
 0x2e0   : > { %719 = vmatmul.mubr.msk.bf16.vlgmr.msra.gmra.mrb[0].mxu1 %vm271_vm1, %v354_v41 }
 0x2e1   : > { %531 = vmatpush1.bf16.msra.mxu1 %v1187_v2  ;;  %562 = vmatprep.mubr.bf16.mxu1 %v990_v3  ;;  %v1248_v3 = vld [vmem:[#allocation7] sm:$0xff] }
 0x2e2   : > { %532 = vmatprep.subr.bf16.mxu1 %v1191_v4  ;;  %v351_v4 = vstv %s1245_s23 }
 0x2e3   : > { %vm352_vm2 = vcmp.eq.s32.totalorder %v1248_v3, %v351_v4 }
 0x2e5   : > { %533 = vmatpush1.bf16.msra.mxu1 %v1194_v5  ;;  %v435_v5 = vstv %s434_s29 }
 0x2e6   : > { %534 = vmatprep.subr.bf16.mxu1 %v1198_v6  ;;  %v226_v6 = vld [vmem:[#allocation4] sm:$0xff]  ;;  %vm436_vm3 = vcmp.eq.s32.totalorder %v1248_v3, %v435_v5  ;;  %v603_v5 = vstv %s602_s6 }
 0x2e7   : > { %vm604_vm5 = vcmp.eq.s32.totalorder %v1248_v3, %v603_v5 }
 0x2e9   : > { %535 = vmatpush1.bf16.msra.mxu1 %v1202_v7 }
 0x2ea   : > { %536 = vmatprep.subr.bf16.mxu1 %v1206_v8 }
 0x2ed   : > { %537 = vmatpush1.bf16.msra.mxu1 %v1210_v9  ;;  %v353_v9 = vsel %vm352_vm2, %v350_v40, %v226_v6 }
 0x3b3   : > { %v396_v44 = vpop.f32.mrb[0].mxu1 }
 0x3b4   : > { %v398_v45 = vpop.f32.mrb[1].mxu1  ;;  %v397_v56 = vadd.f32 %v396_v44, %v357_v55  ;;  %v525_v55 = vunpack.c.l.bf16 %v728_v42 }
 0x3b5   : > { %v399_v46 = vadd.f32 %v398_v45, %v358_v43  ;;  %v400_v47 = vpop.f32.mrb[2].mxu1  ;;  %v526_v43 = vunpack.c.h.bf16 %v728_v42 }
 0x3b6   : > { %v401_v48 = vpop.f32.mrb[3].mxu1  ;;  %v720_v57 = vmul.f32 -1.442695, %v397_v56 }
 0x3b7   : > { %v721_v49 = vmul.f32 -1.442695, %v399_v46 }
 0x3b9   : > { %826 = vpow2.f32 %v721_v49 }
 0x3c3   : > { %v827_v50 = vpop.eup %826 }
 0x3c4   : > { %v410_v51 = vadd.f32 1.0, %v827_v50 }
 0x3c6   : > { %828 = vrcp.f32 %v410_v51 }
 0x3c7   : > { %830 = vpow2.f32 %v720_v57 }
 0x3d0   : > { %v829_v52 = vpop.eup %828 }
 0x3d1   : > { %v415_v53 = vmul.f32 2.0, %v829_v52  ;;  %v831_v58 = vpop.eup %830 }
 0x3d2   : > { %v409_v59 = vadd.f32 1.0, %v831_v58 }
 0x3d3   : > { %v722_v54 = vadd.f32 -1.0, %v415_v53 }
 0x3d4   : > { %832 = vrcp.f32 %v409_v59 }
 0x3d5   : > { %419 = vrot.lane.b32.xlu0 %v722_v54, %s991_s22 }
 0x3de   : > { %v833_v60 = vpop.eup %832 }
 0x3df   : > { %v417_v63 = vmul.f32 %v833_v60, %v344_v37  ;;  %v519_v37 = vstv %s518_s5 }
 0x3e0   : > { %vm520_vm4 = vcmp.eq.s32.totalorder %v1248_v3, %v519_v37 }
 0x447   : > { %v420_v61 = vpop.permute.xlu0 %419 }
 0x448   : > { %v422_v62 = vmul.f32 %v833_v60, %v420_v61 }
 0x44a   : > { %424 = vrot.lane.b32.xlu1 %v422_v62, %s991_s22 }
 0x4bc   : > { %v425_v0 = vpop.permute.xlu1 %424 }
 0x4bd   : > { %v427_v1 = vadd.f32 %v425_v0, %v417_v63 }
 0x4bf   : > { %834 = vtanh.f32 %v427_v1 }
 0x4c9   : > { %v835_v2 = vpop.eup %834 }
 0x4ca   : > { %430 = vrot.lane.b32.xlu0 %v835_v2, %s991_s22 }
 0x53c   : > { %v431_v7 = vpop.permute.xlu0 %430 }
 0x53d   : > { %v433_v8 = vmul.f32 %v829_v52, %v431_v7 }
 0x53f   : > { %v437_v10 = vsel %vm436_vm3, %v433_v8, %v353_v9  ;;  %v438_v11 = vpack.c.bf16 %v433_v8, %v433_v8 }
 0x541   : > { %724 = vmatmul.mubr.msk.bf16.vlgmr.msra.gmra.mrb[4].mxu0 %vm271_vm1, %v438_v11 }
 0x614   : > { %v480_v14 = vpop.f32.mrb[4].mxu0 }
 0x615   : > { %v482_v15 = vpop.f32.mrb[5].mxu0  ;;  %v481_v26 = vadd.f32 %v480_v14, %v441_v25 }
 0x616   : > { %v483_v16 = vadd.f32 %v482_v15, %v442_v13  ;;  %v484_v17 = vpop.f32.mrb[6].mxu0 }
 0x617   : > { %v485_v18 = vpop.f32.mrb[7].mxu0  ;;  %v725_v27 = vmul.f32 -1.442695, %v481_v26 }
 0x618   : > { %v726_v19 = vmul.f32 -1.442695, %v483_v16 }
 0x61a   : > { %836 = vpow2.f32 %v726_v19 }
 0x624   : > { %v837_v20 = vpop.eup %836 }
 0x625   : > { %v494_v21 = vadd.f32 1.0, %v837_v20 }
 0x627   : > { %838 = vrcp.f32 %v494_v21 }
 0x628   : > { %840 = vpow2.f32 %v725_v27 }
 0x631   : > { %v839_v22 = vpop.eup %838 }
 0x632   : > { %v499_v23 = vmul.f32 2.0, %v839_v22  ;;  %v841_v28 = vpop.eup %840 }
 0x633   : > { %v493_v29 = vadd.f32 1.0, %v841_v28 }
 0x634   : > { %v727_v24 = vadd.f32 -1.0, %v499_v23 }
 0x635   : > { %842 = vrcp.f32 %v493_v29 }
 0x636   : > { %503 = vrot.lane.b32.xlu1 %v727_v24, %s991_s22 }
 0x63f   : > { %v843_v30 = vpop.eup %842 }
 0x640   : > { %v501_v33 = vmul.f32 %v843_v30, %v427_v1 }
 0x6a8   : > { %v504_v31 = vpop.permute.xlu1 %503 }
 0x6a9   : > { %v506_v32 = vmul.f32 %v843_v30, %v504_v31 }
 0x6ab   : > { %508 = vrot.lane.b32.xlu0 %v506_v32, %s991_s22 }
 0x71d   : > { %v509_v34 = vpop.permute.xlu0 %508 }
 0x71e   : > { %v511_v35 = vadd.f32 %v509_v34, %v501_v33 }
 0x720   : > { %844 = vtanh.f32 %v511_v35 }
 0x72a   : > { %v845_v36 = vpop.eup %844 }
 0x72b   : > { %514 = vrot.lane.b32.xlu1 %v845_v36, %s991_s22 }
 0x79d   : > { %v515_v38 = vpop.permute.xlu1 %514 }
 0x79e   : > { %v517_v39 = vmul.f32 %v839_v22, %v515_v38 }
 0x7a0   : > { %v521_v40 = vsel %vm520_vm4, %v517_v39, %v437_v10  ;;  %v522_v41 = vpack.c.bf16 %v517_v39, %v517_v39 }
 0x7a2   : > { %729 = vmatmul.mubr.msk.bf16.vlgmr.msra.gmra.mrb[4].mxu1 %vm271_vm1, %v522_v41 }
 0x875   : > { %v564_v44 = vpop.f32.mrb[4].mxu1 }
 0x876   : > { %v566_v45 = vpop.f32.mrb[5].mxu1  ;;  %v565_v56 = vadd.f32 %v564_v44, %v525_v55 }
 0x877   : > { %v567_v46 = vadd.f32 %v566_v45, %v526_v43  ;;  %v568_v47 = vpop.f32.mrb[6].mxu1 }
 0x878   : > { %v569_v48 = vpop.f32.mrb[7].mxu1  ;;  %v730_v57 = vmul.f32 -1.442695, %v565_v56 }
 0x879   : > { %v731_v49 = vmul.f32 -1.442695, %v567_v46 }
 0x87b   : > { %846 = vpow2.f32 %v731_v49 }
 0x885   : > { %v847_v50 = vpop.eup %846 }
 0x886   : > { %v578_v51 = vadd.f32 1.0, %v847_v50 }
 0x888   : > { %848 = vrcp.f32 %v578_v51 }
 0x889   : > { %850 = vpow2.f32 %v730_v57 }
 0x892   : > { %v849_v52 = vpop.eup %848 }
 0x893   : > { %v583_v53 = vmul.f32 2.0, %v849_v52  ;;  %v851_v58 = vpop.eup %850 }
 0x894   : > { %v577_v59 = vadd.f32 1.0, %v851_v58 }
 0x895   : > { %v732_v54 = vadd.f32 -1.0, %v583_v53 }
 0x896   : > { %852 = vrcp.f32 %v577_v59 }
 0x897   : > { %587 = vrot.lane.b32.xlu0 %v732_v54, %s991_s22 }
 0x8a0   : > { %v853_v60 = vpop.eup %852 }
 0x8a1   : > { %v585_v63 = vmul.f32 %v853_v60, %v511_v35 }
 0x909   : > { %v588_v61 = vpop.permute.xlu0 %587 }
 0x90a   : > { %v590_v62 = vmul.f32 %v853_v60, %v588_v61 }
 0x90c   : > { %592 = vrot.lane.b32.xlu1 %v590_v62, %s991_s22 }
 0x97e   : > { %v593_v0 = vpop.permute.xlu1 %592 }
 0x97f   : > { %v595_v1 = vadd.f32 %v593_v0, %v585_v63 }
 0x981   : > { %854 = vtanh.f32 %v595_v1  ;;  %608 = vrot.lane.b32.xlu1 %v595_v1, %s991_s22 }
 0x98b   : > { %v855_v2 = vpop.eup %854 }
 0x98c   : > { %598 = vrot.lane.b32.xlu0 %v855_v2, %s991_s22 }
 0x9f3   : > { %v609_v4 = vpop.permute.xlu1 %608 }
 0x9f4   : > { %611 = vst.msk [vmem:[#allocation3] sm:$0xff] %vm271_vm1, %v609_v4 }
 0x9fc   : > { %616 = sbr.rel (%p733_p6) target bundleno = 2842 (0xb1a), region = 52 }
 0x9fe   : > { %v599_v6 = vpop.permute.xlu0 %598 }
 0x9ff   : > { %v601_v7 = vmul.f32 %v849_v52, %v599_v6 }
 0xa01   : > { %v605_v8 = vsel %vm604_vm5, %v601_v7, %v521_v40  ;;  %606 = vst.msk [vmem:[#allocation2] sm:$0xff] %vm271_vm1, %v601_v7 }
 0xa02   : > { %612 = vst.msk [vmem:[#allocation4] sm:$0xff] %vm271_vm1, %v605_v8  ;;  %618 = vrot.lane.b32.xlu0 (!%p733_p6), %v605_v8, %s992_s19 }
 0xa74   : > { %v619_v9 = vpop.permute.xlu0 %618 }
 0xa75   : > { %v621_v10 = vsub.f32 %v605_v8, %v619_v9 }
 0xa77   : > { %v622_v11 = vadd.f32 1e-06, %v621_v10 }
 0xa79   : > { %v623_v12 = vand.u32 2147483647, %v622_v11 }
 0xa7b   : > { %v625_v13 = vsel %vm624_vm6, %v623_v12, 0.0 }
 0xa7c   : > { %626 = vadd.xlane.f32.xlu0 %v625_v13 }
 0xb09   : > { %v627_v3 = vpop.xlane.xlu0 %626 }
 0xb0a   : > { %v628_v14 = vsub.f32 0.0, %v627_v3 }
 0xb0c   : > { %v629_v15 = vmul.f32 1.442695, %v628_v14 }
 0xb0e   : > { %856 = vpow2.f32 %v629_v15 }
 0xb18   : > { %v857_v16 = vpop.eup %856 }
 0xb19   : > { %632 = vst.msk [vmem:[%s1291_s3] sm:$0xff] %vm631_vm7, %v857_v16 }
 0xb1a PF: > { %p14_p4 = scmp.ge.s32.totalorder %s1035_s17, 4   ;;  %s1307_s12 = smov %s974_s13 }
 0xb1b   : > { %s1308_s13 = smov %s978_s14  ;;  %s1309_s14 = smov %s1045_s20 }
 0xb1c   : > { %s1310_s15 = smov %s1035_s17  ;;  %16 = sbr.rel (!%p14_p4) target bundleno = 4 (0x4), region = 87 }
 0xb23   :  { %644 = vsyncpa [#allocation6], 1 }
 0xb24   :  { %646 = vsyncpa [#allocation6 + $0x1], 1 }
 0xb25   :  { %647 = vsyncpa [#allocation8], 1 }

</bundles_post_ra>
